<compile_context>
chip_gen: v5e
topology: v5e:2x2
jax: 0.10.0
libtpu: 0.0.40
codegen_flags: <defaults>
</compile_context>

<pallas_src>
import functools

import jax
import jax.numpy as jnp
from jax.experimental import pallas as pl
from jax.experimental.pallas import tpu as pltpu

_LANES = 128


# ------------------------------------------------------------------ helpers

def _sublanes_for(dtype):
    # sublane packing: 8 for 32-bit, 16 for 16-bit, 32 for 8-bit
    return max(8, 32 // jnp.dtype(dtype).itemsize)


def _choose_block_rows(rows, dtypes, max_block_rows=1024):
    sub = max(_sublanes_for(d) for d in dtypes)
    rows_up = ((rows + sub - 1) // sub) * sub
    # max_block_rows (1024) is a multiple of every sublane packing we use.
    return min(max_block_rows, rows_up)


def _flatten_pad(a, rows_padded):
    flat = a.reshape(-1)
    pad = rows_padded * _LANES - flat.size
    if pad:
        flat = jnp.pad(flat, (0, pad))
    return flat.reshape(rows_padded, _LANES)


# ------------------------------------------------------------ single step

def _lif_step_kernel(x_ref, mem_ref, syn_ref,
                     spk_ref, new_mem_ref, new_syn_ref,
                     *, beta, alpha, threshold, reset_zero):
    x = x_ref[...]
    mem = mem_ref[...]
    syn = syn_ref[...]

    # TODO(synk): spike_fn is a user-supplied surrogate; only its forward
    # (hard Heaviside step, strict '>') semantics are implemented here.
    fired = mem - threshold > 0.0

    leak = beta * mem + syn
    if reset_zero:
        new_mem = jnp.where(fired, jnp.zeros_like(leak), leak)
    else:
        new_mem = jnp.where(fired, leak - threshold, leak)

    spk_ref[...] = fired.astype(spk_ref.dtype)
    new_mem_ref[...] = new_mem
    new_syn_ref[...] = alpha * syn + x


def lif_forward(x, h=None, *, beta=0.9, alpha=0.8, threshold=1.0,
                reset_zero=True, spike_dtype=None, max_block_rows=1024):
    """One LIF step. x: any shape (e.g. NCHW); h: dict with 'mem','syn' or None."""
    if h is None:
        h = {'mem': jnp.zeros_like(x), 'syn': jnp.zeros_like(x)}
    mem, syn = h['mem'], h['syn']
    spike_dtype = x.dtype if spike_dtype is None else jnp.dtype(spike_dtype)

    orig_shape = x.shape
    total = x.size
    rows = pl.cdiv(total, _LANES)
    block_rows = _choose_block_rows(rows, (x.dtype, spike_dtype), max_block_rows)
    rows_p = pl.cdiv(rows, block_rows) * block_rows

    x2 = _flatten_pad(x, rows_p)
    mem2 = _flatten_pad(mem, rows_p)
    syn2 = _flatten_pad(syn, rows_p)

    kernel = functools.partial(
        _lif_step_kernel,
        beta=float(beta), alpha=float(alpha),
        threshold=float(threshold), reset_zero=bool(reset_zero))

    spec = pl.BlockSpec((block_rows, _LANES), lambda i: (i, 0))
    state_sds = jax.ShapeDtypeStruct((rows_p, _LANES), x.dtype)
    spk_sds = jax.ShapeDtypeStruct((rows_p, _LANES), spike_dtype)

    spk2, new_mem2, new_syn2 = pl.pallas_call(
        kernel,
        out_shape=(spk_sds, state_sds, state_sds),
        grid_spec=pltpu.PrefetchScalarGridSpec(
            num_scalar_prefetch=0,
            grid=(rows_p // block_rows,),
            in_specs=[spec, spec, spec],
            out_specs=[spec, spec, spec],
        ),
        # Update state in place in HBM (mem -> new_mem, syn -> new_syn).
        input_output_aliases={1: 1, 2: 2},
        compiler_params=pltpu.CompilerParams(
            dimension_semantics=("parallel",)),
    )(x2, mem2, syn2)

    def _unflatten(a):
        return a.reshape(-1)[:total].reshape(orig_shape)

    spikes = _unflatten(spk2)
    new_h = {'mem': _unflatten(new_mem2), 'syn': _unflatten(new_syn2)}
    return spikes, new_h


# -------------------------------------------------- fused temporal sequence

def _lif_seq_kernel(x_ref, mem0_ref, syn0_ref,
                    spk_ref, mem_ref, syn_ref,
                    *, beta, alpha, threshold, reset_zero):
    t = pl.program_id(1)

    # Load initial state into the VMEM-resident state blocks once per element
    # block; it then stays resident across the whole time axis.
    @pl.when(t == 0)
    def _():
        mem_ref[...] = mem0_ref[...]
        syn_ref[...] = syn0_ref[...]

    x = x_ref[...]
    mem = mem_ref[...]
    syn = syn_ref[...]

    fired = mem - threshold > 0.0
    leak = beta * mem + syn
    if reset_zero:
        new_mem = jnp.where(fired, jnp.zeros_like(leak), leak)
    else:
        new_mem = jnp.where(fired, leak - threshold, leak)

    spk_ref[...] = fired.astype(spk_ref.dtype)
    mem_ref[...] = new_mem
    syn_ref[...] = alpha * syn + x


def lif_forward_sequence(xs, h=None, *, beta=0.9, alpha=0.8, threshold=1.0,
                         reset_zero=True, spike_dtype=None,
                         max_block_rows=1024):
    """Fused T-step LIF. xs: (T, *feat). Returns (spikes (T, *feat), final h).

    mem/syn live in VMEM across the time axis; per step only x[t] is read and
    spikes[t] written, so HBM traffic drops ~3x vs. calling lif_forward T times.
    """
    T = xs.shape[0]
    feat_shape = xs.shape[1:]
    if h is None:
        h = {'mem': jnp.zeros(feat_shape, xs.dtype),
             'syn': jnp.zeros(feat_shape, xs.dtype)}
    mem, syn = h['mem'], h['syn']
    spike_dtype = xs.dtype if spike_dtype is None else jnp.dtype(spike_dtype)

    total = mem.size
    rows = pl.cdiv(total, _LANES)
    block_rows = _choose_block_rows(rows, (xs.dtype, spike_dtype), max_block_rows)
    rows_p = pl.cdiv(rows, block_rows) * block_rows

    xs2 = xs.reshape(T, -1)
    pad = rows_p * _LANES - xs2.shape[1]
    if pad:
        xs2 = jnp.pad(xs2, ((0, 0), (0, pad)))
    xs3 = xs2.reshape(T, rows_p, _LANES)
    mem2 = _flatten_pad(mem, rows_p)
    syn2 = _flatten_pad(syn, rows_p)

    kernel = functools.partial(
        _lif_seq_kernel,
        beta=float(beta), alpha=float(alpha),
        threshold=float(threshold), reset_zero=bool(reset_zero))

    time_spec = pl.BlockSpec((None, block_rows, _LANES), lambda i, t: (t, i, 0))
    spk_spec = pl.BlockSpec((None, block_rows, _LANES), lambda i, t: (t, i, 0))
    # Same block index across t => resident across the time axis (no re-DMA /
    # no writeback until the element-block index changes).
    state_spec = pl.BlockSpec((block_rows, _LANES), lambda i, t: (i, 0))

    spk3, mem_f, syn_f = pl.pallas_call(
        kernel,
        out_shape=(jax.ShapeDtypeStruct((T, rows_p, _LANES), spike_dtype),
                   jax.ShapeDtypeStruct((rows_p, _LANES), xs.dtype),
                   jax.ShapeDtypeStruct((rows_p, _LANES), xs.dtype)),
        grid_spec=pltpu.PrefetchScalarGridSpec(
            num_scalar_prefetch=0,
            grid=(rows_p // block_rows, T),
            in_specs=[time_spec, state_spec, state_spec],
            out_specs=[spk_spec, state_spec, state_spec],
        ),
        input_output_aliases={1: 1, 2: 2},
        compiler_params=pltpu.CompilerParams(
            dimension_semantics=("parallel", "arbitrary")),
    )(xs3, mem2, syn2)

    spikes = spk3.reshape(T, -1)[:, :total].reshape((T,) + feat_shape)
    new_h = {'mem': mem_f.reshape(-1)[:total].reshape(feat_shape),
             'syn': syn_f.reshape(-1)[:total].reshape(feat_shape)}
    return spikes, new_h


# -------------------------------------------------------------- reference

def _lif_ref_step(x, h, *, beta, alpha, threshold, reset_zero):
    spk = (h['mem'] - threshold > 0).astype(x.dtype)
    leak = beta * h['mem'] + h['syn']
    mem = leak * (1.0 - spk) if reset_zero else leak - spk * threshold
    syn = alpha * h['syn'] + x
    return spk, {'mem': mem, 'syn': syn}


if __name__ == "__main__":
    key = jax.random.PRNGKey(0)
    kx, km, ks, kt = jax.random.split(key, 4)

    # NCHW input, same convention as the PyTorch module; small demo shapes.
    B, C, H, W = 2, 4, 16, 16
    T = 8
    params = dict(beta=0.9, alpha=0.8, threshold=1.0, reset_zero=True)

    x = jax.random.normal(kx, (B, C, H, W), dtype=jnp.float32)
    h_rand = {'mem': jax.random.normal(km, (B, C, H, W), dtype=jnp.float32) * 2.0,
              'syn': jax.random.normal(ks, (B, C, H, W), dtype=jnp.float32)}

    # 1) single step, h=None (zero state)
    spikes0, h1 = lif_forward(x, None, **params)

    # 2) single step, random state, reset-to-zero branch
    spikes1, h2 = lif_forward(x, h_rand, **params)

    # 3) single step, random state, subtractive-reset branch
    params_sub = dict(params, reset_zero=False)
    spikes2, h3 = lif_forward(x, h_rand, **params_sub)

    # 4) fused temporal sequence
    xs = jax.random.normal(kt, (T, B, C, H, W), dtype=jnp.float32)
    spikes_seq, h_seq = lif_forward_sequence(xs, h_rand, **params)

    jax.block_until_ready((spikes0, spikes1, spikes2, spikes_seq,
                           h1['mem'], h2['mem'], h3['mem'],
                           h_seq['mem'], h_seq['syn']))

    # ---- correctness checks against a plain-JAX reference ----
    assert float(jnp.abs(spikes0).sum()) == 0.0          # mem=0 < threshold
    assert jnp.allclose(h1['syn'], x, atol=1e-6)

    ref_spk1, ref_h2 = _lif_ref_step(x, h_rand, **params)
    assert jnp.allclose(spikes1, ref_spk1)
    assert jnp.allclose(h2['mem'], ref_h2['mem'], atol=1e-6)
    assert jnp.allclose(h2['syn'], ref_h2['syn'], atol=1e-6)

    ref_spk2, ref_h3 = _lif_ref_step(x, h_rand, **params_sub)
    assert jnp.allclose(spikes2, ref_spk2)
    assert jnp.allclose(h3['mem'], ref_h3['mem'], atol=1e-6)
    assert jnp.allclose(h3['syn'], ref_h3['syn'], atol=1e-6)

    hr = {'mem': h_rand['mem'], 'syn': h_rand['syn']}
    for t in range(T):
        ref_spk_t, hr = _lif_ref_step(xs[t], hr, **params)
        assert jnp.allclose(spikes_seq[t], ref_spk_t)
    assert jnp.allclose(h_seq['mem'], hr['mem'], atol=1e-5)
    assert jnp.allclose(h_seq['syn'], hr['syn'], atol=1e-5)

    print("KERNEL_OK")
</pallas_src>

<mosaic_0001>
module attributes {stable_mosaic.version = 11 : i64} {
  func.func @_lif_step_kernel(%arg0: i32, %arg1: memref<16x128xf32, #tpu.memory_space<vmem>>, %arg2: memref<16x128xf32, #tpu.memory_space<vmem>>, %arg3: memref<16x128xf32, #tpu.memory_space<vmem>>, %arg4: memref<16x128xf32, #tpu.memory_space<vmem>>, %arg5: memref<16x128xf32, #tpu.memory_space<vmem>>, %arg6: memref<16x128xf32, #tpu.memory_space<vmem>>) attributes {dimension_semantics = [#tpu.dimension_semantics<parallel>], iteration_bounds = array<i64: 1>, scalar_prefetch = 0 : i64, scratch_operands = 0 : i64, tpu.core_type = #tpu.core_type<tc>, window_params = [{transform_indices = @transform_0, window_bounds = array<i64: 16, 128>}, {transform_indices = @transform_1, window_bounds = array<i64: 16, 128>}, {transform_indices = @transform_2, window_bounds = array<i64: 16, 128>}, {transform_indices = @transform_3, window_bounds = array<i64: 16, 128>}, {transform_indices = @transform_4, window_bounds = array<i64: 16, 128>}, {transform_indices = @transform_5, window_bounds = array<i64: 16, 128>}]} {
    %c0 = arith.constant 0 : index
    %c0_0 = arith.constant 0 : index
    %0 = vector.load %arg1[%c0, %c0_0] : memref<16x128xf32, #tpu.memory_space<vmem>>, vector<16x128xf32>
    %c0_1 = arith.constant 0 : index
    %c0_2 = arith.constant 0 : index
    %1 = vector.load %arg2[%c0_1, %c0_2] : memref<16x128xf32, #tpu.memory_space<vmem>>, vector<16x128xf32>
    %c0_3 = arith.constant 0 : index
    %c0_4 = arith.constant 0 : index
    %2 = vector.load %arg3[%c0_3, %c0_4] : memref<16x128xf32, #tpu.memory_space<vmem>>, vector<16x128xf32>
    %cst = arith.constant 1.000000e+00 : f32
    %3 = vector.broadcast %cst : f32 to vector<16x128xf32>
    %4 = arith.subf %1, %3 : vector<16x128xf32>
    %cst_5 = arith.constant 0.000000e+00 : f32
    %5 = vector.broadcast %cst_5 : f32 to vector<16x128xf32>
    %6 = arith.cmpf ogt, %4, %5 : vector<16x128xf32>
    %cst_6 = arith.constant 0.899999976 : f32
    %7 = vector.broadcast %cst_6 : f32 to vector<16x128xf32>
    %8 = arith.mulf %7, %1 : vector<16x128xf32>
    %9 = arith.addf %8, %2 : vector<16x128xf32>
    %cst_7 = arith.constant 0.000000e+00 : f32
    %10 = vector.broadcast %cst_7 : f32 to vector<16x128xf32>
    %11 = arith.select %6, %10, %9 : vector<16x128xi1>, vector<16x128xf32>
    %12 = arith.extui %6 : vector<16x128xi1> to vector<16x128xi32>
    %13 = arith.sitofp %12 : vector<16x128xi32> to vector<16x128xf32>
    %c0_8 = arith.constant 0 : index
    %c0_9 = arith.constant 0 : index
    %14 = vector.load %arg4[%c0_8, %c0_9] : memref<16x128xf32, #tpu.memory_space<vmem>>, vector<16x128xf32>
    tpu.vector_store %arg4[%c0_8, %c0_9], %13 {strides = array<i32>} : memref<16x128xf32, #tpu.memory_space<vmem>>, vector<16x128xf32>,
    %c0_10 = arith.constant 0 : index
    %c0_11 = arith.constant 0 : index
    %15 = vector.load %arg5[%c0_10, %c0_11] : memref<16x128xf32, #tpu.memory_space<vmem>>, vector<16x128xf32>
    tpu.vector_store %arg5[%c0_10, %c0_11], %11 {strides = array<i32>} : memref<16x128xf32, #tpu.memory_space<vmem>>, vector<16x128xf32>,
    %cst_12 = arith.constant 8.000000e-01 : f32
    %16 = vector.broadcast %cst_12 : f32 to vector<16x128xf32>
    %17 = arith.mulf %16, %2 : vector<16x128xf32>
    %18 = arith.addf %17, %0 : vector<16x128xf32>
    %c0_13 = arith.constant 0 : index
    %c0_14 = arith.constant 0 : index
    %19 = vector.load %arg6[%c0_13, %c0_14] : memref<16x128xf32, #tpu.memory_space<vmem>>, vector<16x128xf32>
    tpu.vector_store %arg6[%c0_13, %c0_14], %18 {strides = array<i32>} : memref<16x128xf32, #tpu.memory_space<vmem>>, vector<16x128xf32>,
    return
  }
  func.func @transform_0(%arg0: i32) -> (i32, i32) {
    %c0_i32 = arith.constant 0 : i32
    %c0_i32_0 = arith.constant 0 : i32
    return %arg0, %c0_i32 : i32, i32
  }
  func.func @transform_1(%arg0: i32) -> (i32, i32) {
    %c0_i32 = arith.constant 0 : i32
    %c0_i32_0 = arith.constant 0 : i32
    return %arg0, %c0_i32 : i32, i32
  }
  func.func @transform_2(%arg0: i32) -> (i32, i32) {
    %c0_i32 = arith.constant 0 : i32
    %c0_i32_0 = arith.constant 0 : i32
    return %arg0, %c0_i32 : i32, i32
  }
  func.func @transform_3(%arg0: i32) -> (i32, i32) {
    %c0_i32 = arith.constant 0 : i32
    %c0_i32_0 = arith.constant 0 : i32
    return %arg0, %c0_i32 : i32, i32
  }
  func.func @transform_4(%arg0: i32) -> (i32, i32) {
    %c0_i32 = arith.constant 0 : i32
    %c0_i32_0 = arith.constant 0 : i32
    return %arg0, %c0_i32 : i32, i32
  }
  func.func @transform_5(%arg0: i32) -> (i32, i32) {
    %c0_i32 = arith.constant 0 : i32
    %c0_i32_0 = arith.constant 0 : i32
    return %arg0, %c0_i32 : i32, i32
  }
}

</mosaic_0001>

<bundles_post_ra>
// kernel: tpu_custom_call.1
= control target key start
LH: loop header
LB: loop body
LE: loop exit
PB: predicated region body
PF: predicated region fallthrough
CT: control target
= control target key end

     0   :  { %11 = vsyncpa [#allocation3], 0  ;;  %s358_s0 = inlined_call_operand.vmem [shape: f32[16,128], index: 0, kind: input, shape index: {}]   ;;  %s359_s1 = inlined_call_operand.hbm [shape: f32[16,128], index: 1, kind: input, shape index: {}, may-alias: {1,4}]   ;;  %s360_s2 = inlined_call_operand.hbm [shape: f32[16,128], index: 2, kind: input, shape index: {}, may-alias: {2,5}]   ;;  %s361_s3 = inlined_call_operand.hbm [shape: f32[16,128], index: 3, kind: output, shape index: {0}]   ;;  %s362_s4 = inlined_call_operand.hbm [shape: f32[16,128], index: 4, kind: output, shape index: {1}, may-alias: {1,4}]   ;;  %s363_s5 = inlined_call_operand.hbm [shape: f32[16,128], index: 5, kind: output, shape index: {2}, may-alias: {2,5}]  }
   0x1   :  { %12 = vsyncpa [#allocation6], 0 }
   0x2   :  { %13 = vsyncpa [#allocation4], 0 }
   0x3   :  { %14 = vsyncpa [#allocation9], 0  ;;  %s21_s20 = sshll.u32 %s359_s1, 4  ;;  %s276_s21 = smov [#allocation2]   ;;  %s22_s20 = int_to_ptr.hbm [resolvable:$true] %s21_s20 }
   0x4   :  { %s23_s22 = sshll.u32 %s276_s21, 4  ;;  %s34_s25 = sshll.u32 %s360_s2, 4  ;;  %s24_s22 = int_to_ptr.vmem [resolvable:$true] %s23_s22  ;;  %s35_s25 = int_to_ptr.hbm [resolvable:$true] %s34_s25 }
   0x5   :  { %s277_s26 = smov 128   ;;  %s278_s27 = smov 8  }
   0x6   :  { %29 = dma.hbm_to_vmem [thread:$0]  %s22_s20, 256, %s24_s22, [#allocation3], %s277_s26, %s277_s26, %s278_s27  }
   0x7   :  { %s279_s28 = smov [#allocation5]  }
   0x8   :  { %s36_s29 = sshll.u32 %s279_s28, 4  ;;  %s37_s29 = int_to_ptr.vmem [resolvable:$true] %s36_s29 }
   0x9   :  { %42 = dma.hbm_to_vmem [thread:$0]  %s35_s25, 256, %s37_s29, [#allocation6], %s277_s26, %s277_s26, %s278_s27  }
   0xa   :  { %268 = dma.done.wait [#allocation3], 256  }
   0xb   :  { %269 = vsyncadd [#allocation3], 4294967040 }
   0xc   :  { %270 = dma.done.wait [#allocation6], 256  }
   0xd   :  { %271 = vsyncadd [#allocation6], 4294967040  ;;  %v53_v0 = vld [vmem:[#allocation2] sm:$0xff]  ;;  %v55_v1 = vld [vmem:[#allocation5] sm:$0xff]  ;;  %s280_s1 = smov [#allocation8]   ;;  %s100_s7 = sshll.u32 %s362_s4, 4  ;;  %s101_s7 = int_to_ptr.hbm [resolvable:$true] %s100_s7 }
   0xe   :  { %v54_v2 = vld [vmem:[#allocation2 + $0x8] sm:$0xff]  ;;  %s326_s2 = sshll.u32 %s280_s1, 4  ;;  %v136_v3 = vadd.f32 -1.0, %v53_v0  ;;  %v61_v4 = vmul.f32 0.9, %v53_v0  ;;  %v56_v5 = vld [vmem:[#allocation5 + $0x8] sm:$0xff]  ;;  %s99_s2 = int_to_ptr.vmem [resolvable:$true] %s326_s2 }
   0xf   :  { %v137_v6 = vadd.f32 -1.0, %v54_v2  ;;  %v62_v7 = vmul.f32 0.9, %v54_v2  ;;  %v51_v8 = vld [vmem:[%s358_s0] sm:$0xff]  ;;  %v75_v9 = vmul.f32 0.8, %v55_v1 }
  0x10   :  { %s281_s10 = smov [#allocation7]   ;;  %vm59_vm0 = vcmp.gt.f32.partialorder %v136_v3, 0.0  ;;  %v63_v10 = vadd.f32 %v61_v4, %v55_v1  ;;  %v52_v11 = vld [vmem:[%s358_s0 + $0x8] sm:$0xff]  ;;  %v76_v12 = vmul.f32 0.8, %v56_v5  ;;  %s87_s15 = sshll.u32 %s361_s3, 4  ;;  %s88_s15 = int_to_ptr.hbm [resolvable:$true] %s87_s15 }
  0x11   :  { %s334_s11 = sshll.u32 %s281_s10, 4  ;;  %vm60_vm1 = vcmp.gt.f32.partialorder %v137_v6, 0.0  ;;  %v64_v13 = vadd.f32 %v62_v7, %v56_v5  ;;  %v282_v14 = vmov 0.0   ;;  %s283_s16 = smov [#allocation10]   ;;  %v77_v18 = vadd.f32 %v75_v9, %v51_v8  ;;  %s86_s11 = int_to_ptr.vmem [resolvable:$true] %s334_s11 }
  0x12   :  { %v138_v15 = vsel %vm59_vm0, 1.0, %v282_v14  ;;  %s111_s17 = sshll.u32 %s283_s16, 4  ;;  %s113_s20 = sshll.u32 %s363_s5, 4  ;;  %v65_v16 = vsel %vm59_vm0, 0.0, %v63_v10  ;;  %v139_v17 = vsel %vm60_vm1, 1.0, %v282_v14  ;;  %v78_v20 = vadd.f32 %v76_v12, %v52_v11  ;;  %s112_s17 = int_to_ptr.vmem [resolvable:$true] %s111_s17  ;;  %s114_s20 = int_to_ptr.hbm [resolvable:$true] %s113_s20 }
  0x13   :  { %71 = vst [vmem:[#allocation7] sm:$0xff] %v138_v15  ;;  %v66_v19 = vsel %vm60_vm1, 0.0, %v64_v13 }
  0x14   :  { %73 = vst [vmem:[#allocation8] sm:$0xff] %v65_v16 }
  0x15   :  { %74 = vst [vmem:[#allocation8 + $0x8] sm:$0xff] %v66_v19 }
  0x16   :  { %72 = vst [vmem:[#allocation7 + $0x8] sm:$0xff] %v139_v17  ;;  %106 = dma.vmem_to_hbm [thread:$0]  %s99_s2, 256, %s101_s7, [#allocation9], %s277_s26, %s277_s26, %s278_s27  }
  0x17   :  { %79 = vst [vmem:[#allocation10] sm:$0xff] %v77_v18  ;;  %93 = dma.vmem_to_hbm [thread:$0]  %s86_s11, 256, %s88_s15, [#allocation4], %s277_s26, %s277_s26, %s278_s27  }
  0x18   :  { %80 = vst [vmem:[#allocation10 + $0x8] sm:$0xff] %v78_v20 }
  0x19   :  { %119 = dma.vmem_to_hbm [thread:$0]  %s112_s17, 256, %s114_s20, [#allocation9], %s277_s26, %s277_s26, %s278_s27  }
  0x1a   :  { %272 = dma.done.wait [#allocation4], 256  }
  0x1b   :  { %273 = vsyncadd [#allocation4], 4294967040 }
  0x1c   :  { %274 = dma.done.wait [#allocation9], 512  }
  0x1d   :  { %275 = vsyncadd [#allocation9], 4294966784 }
  0x1e   :  { %132 = vsyncpa [#allocation3], 1 }
  0x1f   :  { %133 = vsyncpa [#allocation6], 1 }
  0x20   :  { %134 = vsyncpa [#allocation4], 1 }
  0x21   :  { %135 = vsyncpa [#allocation9], 1 }

</bundles_post_ra>
